<compile_context>
chip_gen: v5e
topology: v5e:2x2
jax: 0.10.0
libtpu: 0.0.40
codegen_flags: <defaults>
</compile_context>

<pallas_src>
import jax
import jax.numpy as jnp
from jax.experimental import pallas as pl
from jax.experimental.pallas import tpu as pltpu


# ---------------------------------------------------------------------------
# small helpers
# ---------------------------------------------------------------------------
def _round_up(x, m):
    return ((x + m - 1) // m) * m


def _choose_tile_n(n, per_node_f32_elems):
    """Lane-axis tile (multiple of 128), sized so the double-buffered working
    set stays ~8 MiB -> comfortably inside scoped VMEM on every generation
    (v7x: 64 MiB physical / 32 MiB scoped per TensorCore)."""
    n128 = max(128, _round_up(n, 128))
    budget_elems = (4 * 1024 * 1024) // 4          # ~4 MiB of f32 per buffer set
    t = budget_elems // max(int(per_node_f32_elems), 1)
    t = max(128, min(2048, (t // 128) * 128))
    return min(t, n128)


def _pad_last(x, n_pad):
    pad = n_pad - x.shape[-1]
    if pad == 0:
        return x
    widths = [(0, 0)] * (x.ndim - 1) + [(0, pad)]
    return jnp.pad(x, widths)


def gamma_l(cfg, num_layer):
    return cfg["delta"] * (num_layer + cfg["delta"]) ** (-1) + 1.0


# lane-dense per-tile partial output block (fully dense (8,128) stores)
_PARTIAL_BLOCK = (1, 8, 128)


def _partial_out_shape(num_tiles):
    return jax.ShapeDtypeStruct((num_tiles, 8, 128), jnp.float32)


# ---------------------------------------------------------------------------
# in-kernel math helpers (classes on sublanes, nodes on lanes)
# ---------------------------------------------------------------------------
def _masked_ce_partial(x, sel, mask):
    """sum over masked nodes of -log_softmax(x)[target].
    x: [C, T] logits, sel: [C, T] bool (iota==label), mask: [1, T] f32."""
    picked = jnp.sum(jnp.where(sel, x, 0.0), axis=0, keepdims=True)      # [1, T]
    m = jnp.max(x, axis=0, keepdims=True)
    lse = m + jnp.log(jnp.sum(jnp.exp(x - m), axis=0, keepdims=True))    # [1, T]
    return jnp.sum(mask * (lse - picked))


def _bce_partial(x, z, colmask):
    """sum over valid node-columns of elementwise BCE-with-logits."""
    per = jnp.maximum(x, 0.0) - x * z + jnp.log(1.0 + jnp.exp(-jnp.abs(x)))
    return jnp.sum(per * colmask)


# ---------------------------------------------------------------------------
# kernels
# ---------------------------------------------------------------------------
def _ce_gat_kernel(out_ref, lab_ref, mask_ref, num_ref):
    x = out_ref[...].astype(jnp.float32)               # [C, T]
    lab = lab_ref[...]                                  # [1, T] int32
    mask = mask_ref[...]                                # [1, T] f32
    cls = jax.lax.broadcasted_iota(jnp.int32, x.shape, 0)
    num = _masked_ce_partial(x, cls == lab, mask)
    num_ref[...] = jnp.full(num_ref.shape, num, dtype=jnp.float32)


def _ce_deepgat_kernel(gam_ref, out_ref, lab_ref, mask_ref, hs_ref,
                       num_ref, acc_ref):
    l = pl.program_id(1)
    n_layers = pl.num_programs(1)

    lab = lab_ref[...]                                  # [1, T]
    mask = mask_ref[...]                                # [1, T]
    cls = jax.lax.broadcasted_iota(
        jnp.int32, (out_ref.shape[0], lab.shape[1]), 0)
    sel = cls == lab

    # first layer for this tile: (re)initialise with the weighted base term
    @pl.when(l == 0)
    def _():
        base = _masked_ce_partial(out_ref[...].astype(jnp.float32), sel, mask)
        acc_ref[0] = gam_ref[gam_ref.shape[0] - 1] * base

    h = hs_ref[...].astype(jnp.float32)                 # [H, C, T]
    xh = jnp.sum(h, axis=0) * (1.0 / h.shape[0])        # head mean, one scale
    acc_ref[0] = acc_ref[0] + gam_ref[l] * _masked_ce_partial(xh, sel, mask)

    @pl.when(l == n_layers - 1)
    def _():
        num_ref[...] = jnp.full(num_ref.shape, acc_ref[0], dtype=jnp.float32)


def _bce_gat_kernel(out_ref, y_ref, colmask_ref, sum_ref):
    x = out_ref[...].astype(jnp.float32)
    z = y_ref[...].astype(jnp.float32)
    cm = colmask_ref[...]
    s = _bce_partial(x, z, cm)
    sum_ref[...] = jnp.full(sum_ref.shape, s, dtype=jnp.float32)


def _bce_deepgat_kernel(gam_ref, out_ref, y_ref, colmask_ref, hs_ref,
                        sum_ref, acc_ref):
    l = pl.program_id(1)
    n_layers = pl.num_programs(1)
    z = y_ref[...].astype(jnp.float32)
    cm = colmask_ref[...]

    @pl.when(l == 0)
    def _():
        base = _bce_partial(out_ref[...].astype(jnp.float32), z, cm)
        acc_ref[0] = gam_ref[gam_ref.shape[0] - 1] * base

    h = hs_ref[...].astype(jnp.float32)                 # [H, C, T]
    xh = jnp.sum(h, axis=0) * (1.0 / h.shape[0])
    acc_ref[0] = acc_ref[0] + gam_ref[l] * _bce_partial(xh, z, cm)

    @pl.when(l == n_layers - 1)
    def _():
        sum_ref[...] = jnp.full(sum_ref.shape, acc_ref[0], dtype=jnp.float32)


# ---------------------------------------------------------------------------
# wrappers (layout plumbing + one pallas_call each + tiny JAX epilogue)
# ---------------------------------------------------------------------------
def transductive_gat_loss(out, y, mask):
    n, c = out.shape
    tile = _choose_tile_n(n, c + 2)
    n_pad = _round_up(n, tile)
    num_tiles = n_pad // tile

    out_t = _pad_last(out.astype(jnp.float32).T, n_pad)          # [C, Np]
    lab = _pad_last(y.astype(jnp.int32)[None, :], n_pad)         # [1, Np]
    msk = _pad_last(mask.astype(jnp.float32)[None, :], n_pad)    # [1, Np]

    nums = pl.pallas_call(
        _ce_gat_kernel,
        out_shape=_partial_out_shape(num_tiles),
        grid=(num_tiles,),
        in_specs=[
            pl.BlockSpec((c, tile), lambda i: (0, i)),
            pl.BlockSpec((1, tile), lambda i: (0, i)),
            pl.BlockSpec((1, tile), lambda i: (0, i)),
        ],
        out_specs=pl.BlockSpec(_PARTIAL_BLOCK, lambda i: (i, 0, 0)),
        compiler_params=pltpu.CompilerParams(dimension_semantics=("parallel",)),
    )(out_t, lab, msk)

    den = jnp.sum(mask.astype(jnp.float32))   # NaN if mask all-False (same as torch)
    return jnp.sum(nums[:, 0, 0]) / den


def transductive_deepgat_loss(cfg, out, y, mask, hs):
    n, c = out.shape
    num_hs = len(hs)
    nh = hs[0].shape[1]
    tile = _choose_tile_n(n, nh * c + c + 2)
    n_pad = _round_up(n, tile)
    num_tiles = n_pad // tile

    out_t = _pad_last(out.astype(jnp.float32).T, n_pad)                     # [C, Np]
    lab = _pad_last(y.astype(jnp.int32)[None, :], n_pad)                    # [1, Np]
    msk = _pad_last(mask.astype(jnp.float32)[None, :], n_pad)               # [1, Np]
    hs_t = _pad_last(
        jnp.stack(hs).astype(jnp.float32).transpose(0, 2, 3, 1), n_pad)     # [L, H, C, Np]

    gam = jnp.asarray(
        [gamma_l(cfg, i) for i in range(num_hs)] + [gamma_l(cfg, cfg["num_layer"])],
        dtype=jnp.float32)

    nums = pl.pallas_call(
        _ce_deepgat_kernel,
        out_shape=_partial_out_shape(num_tiles),
        grid=(num_tiles, num_hs),
        in_specs=[
            pl.BlockSpec(memory_space=pltpu.MemorySpace.SMEM),              # gammas
            pl.BlockSpec((c, tile), lambda i, l: (0, i)),
            pl.BlockSpec((1, tile), lambda i, l: (0, i)),
            pl.BlockSpec((1, tile), lambda i, l: (0, i)),
            pl.BlockSpec((None, nh, c, tile), lambda i, l: (l, 0, 0, i)),
        ],
        out_specs=pl.BlockSpec(_PARTIAL_BLOCK, lambda i, l: (i, 0, 0)),
        scratch_shapes=[pltpu.SMEM((1,), jnp.float32)],
        compiler_params=pltpu.CompilerParams(
            dimension_semantics=("parallel", "arbitrary")),
    )(gam, out_t, lab, msk, hs_t)

    den = jnp.sum(mask.astype(jnp.float32))
    return jnp.sum(nums[:, 0, 0]) / den


def inductive_gat_loss(out, y):
    n, c = out.shape
    tile = _choose_tile_n(n, 2 * c + 1)
    n_pad = _round_up(n, tile)
    num_tiles = n_pad // tile

    out_t = _pad_last(out.astype(jnp.float32).T, n_pad)
    y_t = _pad_last(y.astype(jnp.float32).T, n_pad)
    cmask = _pad_last(jnp.ones((1, n), jnp.float32), n_pad)

    sums = pl.pallas_call(
        _bce_gat_kernel,
        out_shape=_partial_out_shape(num_tiles),
        grid=(num_tiles,),
        in_specs=[
            pl.BlockSpec((c, tile), lambda i: (0, i)),
            pl.BlockSpec((c, tile), lambda i: (0, i)),
            pl.BlockSpec((1, tile), lambda i: (0, i)),
        ],
        out_specs=pl.BlockSpec(_PARTIAL_BLOCK, lambda i: (i, 0, 0)),
        compiler_params=pltpu.CompilerParams(dimension_semantics=("parallel",)),
    )(out_t, y_t, cmask)

    return jnp.sum(sums[:, 0, 0]) / float(n * c)


def inductive_deepgat_loss(cfg, out, y, hs):
    n, c = out.shape
    num_hs = len(hs)
    nh = hs[0].shape[1]
    tile = _choose_tile_n(n, nh * c + 2 * c + 1)
    n_pad = _round_up(n, tile)
    num_tiles = n_pad // tile

    out_t = _pad_last(out.astype(jnp.float32).T, n_pad)
    y_t = _pad_last(y.astype(jnp.float32).T, n_pad)
    cmask = _pad_last(jnp.ones((1, n), jnp.float32), n_pad)
    hs_t = _pad_last(
        jnp.stack(hs).astype(jnp.float32).transpose(0, 2, 3, 1), n_pad)     # [L, H, C, Np]

    gam = jnp.asarray(
        [gamma_l(cfg, i) for i in range(num_hs)] + [gamma_l(cfg, cfg["num_layer"])],
        dtype=jnp.float32)

    sums = pl.pallas_call(
        _bce_deepgat_kernel,
        out_shape=_partial_out_shape(num_tiles),
        grid=(num_tiles, num_hs),
        in_specs=[
            pl.BlockSpec(memory_space=pltpu.MemorySpace.SMEM),
            pl.BlockSpec((c, tile), lambda i, l: (0, i)),
            pl.BlockSpec((c, tile), lambda i, l: (0, i)),
            pl.BlockSpec((1, tile), lambda i, l: (0, i)),
            pl.BlockSpec((None, nh, c, tile), lambda i, l: (l, 0, 0, i)),
        ],
        out_specs=pl.BlockSpec(_PARTIAL_BLOCK, lambda i, l: (i, 0, 0)),
        scratch_shapes=[pltpu.SMEM((1,), jnp.float32)],
        compiler_params=pltpu.CompilerParams(
            dimension_semantics=("parallel", "arbitrary")),
    )(gam, out_t, y_t, cmask, hs_t)

    return jnp.sum(sums[:, 0, 0]) / float(n * c)


# ---------------------------------------------------------------------------
# Loss_func.forward equivalent
# ---------------------------------------------------------------------------
def loss_func_forward(cfg, out, y, mask=None, hs=()):
    hs = list(hs)
    if cfg["task"] == "Transductive":
        if cfg["model"] == "GAT":
            return transductive_gat_loss(out, y, mask)
        if cfg["model"] == "DeepGAT":
            if not hs:
                return transductive_gat_loss(out, y, mask) * gamma_l(cfg, cfg["num_layer"])
            return transductive_deepgat_loss(cfg, out, y, mask, hs)
    elif cfg["task"] == "Inductive":
        if cfg["model"] == "GAT":
            return inductive_gat_loss(out, y)
        if cfg["model"] == "DeepGAT":
            if not hs:
                return inductive_gat_loss(out, y) * gamma_l(cfg, cfg["num_layer"])
            return inductive_deepgat_loss(cfg, out, y, hs)
    raise ValueError("unsupported cfg")


# ---------------------------------------------------------------------------
# pure-JAX reference (correctness check only)
# ---------------------------------------------------------------------------
def _ref_masked_ce(logits, y, mask):
    logp = jax.nn.log_softmax(logits.astype(jnp.float32), axis=-1)
    picked = jnp.take_along_axis(logp, y[:, None], axis=-1)[:, 0]
    m = mask.astype(jnp.float32)
    return jnp.sum(m * (-picked)) / jnp.sum(m)


def _ref_bce(logits, targets):
    x = logits.astype(jnp.float32)
    z = targets.astype(jnp.float32)
    per = jnp.maximum(x, 0.0) - x * z + jnp.log1p(jnp.exp(-jnp.abs(x)))
    return jnp.mean(per)


def _ref_forward(cfg, out, y, mask=None, hs=()):
    if cfg["task"] == "Transductive":
        base = _ref_masked_ce(out, y, mask)
        if cfg["model"] == "GAT":
            return base
        loss = base * gamma_l(cfg, cfg["num_layer"])
        for n_layer, h in enumerate(hs):
            loss = loss + _ref_masked_ce(h.mean(axis=1), y, mask) * gamma_l(cfg, n_layer)
        return loss
    else:
        base = _ref_bce(out, y)
        if cfg["model"] == "GAT":
            return base
        loss = base * gamma_l(cfg, cfg["num_layer"])
        for n_layer, h in enumerate(hs):
            loss = loss + _ref_bce(h.mean(axis=1), y) * gamma_l(cfg, n_layer)
        return loss


# ---------------------------------------------------------------------------
if __name__ == "__main__":
    key = jax.random.PRNGKey(0)

    def make_inputs(key, n, c, nh, nl):
        k_out, k_y, k_mask, k_h, k_ym = jax.random.split(key, 5)
        out = jax.random.normal(k_out, (n, c), dtype=jnp.float32)
        y_int = jax.random.randint(k_y, (n,), 0, c)
        mask = jax.random.bernoulli(k_mask, 0.6, (n,)).at[0].set(True)
        hkeys = jax.random.split(k_h, nl)
        hs = [jax.random.normal(hk, (n, nh, c), dtype=jnp.float32) for hk in hkeys]
        y_multi = jax.random.bernoulli(k_ym, 0.5, (n, c)).astype(jnp.float32)
        return out, y_int, mask, hs, y_multi

    cfgs = [
        {"task": "Transductive", "model": "GAT", "num_layer": 2, "delta": 0.5},
        {"task": "Transductive", "model": "DeepGAT", "num_layer": 2, "delta": 0.5},
        {"task": "Inductive", "model": "GAT", "num_layer": 2, "delta": 0.5},
        {"task": "Inductive", "model": "DeepGAT", "num_layer": 2, "delta": 0.5},
    ]

    # small shapes + a multi-tile case (exercises padding + the parallel tile grid)
    k_small, k_big = jax.random.split(key)
    test_sets = [
        make_inputs(k_small, n=8, c=8, nh=4, nl=2),      # single 128-lane tile
        make_inputs(k_big, n=2500, c=8, nh=4, nl=2),     # 2 tiles of 2048 lanes
    ]

    for out, y_int, mask, hs, y_multi in test_sets:
        for cfg in cfgs:
            if cfg["task"] == "Transductive":
                loss = loss_func_forward(cfg, out, y_int, mask=mask, hs=hs)
                ref = _ref_forward(cfg, out, y_int, mask=mask, hs=hs)
            else:
                loss = loss_func_forward(cfg, out, y_multi, hs=hs)
                ref = _ref_forward(cfg, out, y_multi, hs=hs)
            loss = jax.block_until_ready(loss)
            assert jnp.allclose(loss, ref, rtol=1e-4, atol=1e-5), (cfg, loss, ref)

    print("KERNEL_OK")
</pallas_src>

<mosaic_0001>
module attributes {stable_mosaic.version = 11 : i64} {
  func.func @_ce_gat_kernel(%arg0: i32, %arg1: memref<8x128xf32, #tpu.memory_space<vmem>>, %arg2: memref<1x128xi32, #tpu.memory_space<vmem>>, %arg3: memref<1x128xf32, #tpu.memory_space<vmem>>, %arg4: memref<1x8x128xf32, #tpu.memory_space<vmem>>) attributes {dimension_semantics = [#tpu.dimension_semantics<parallel>], iteration_bounds = array<i64: 1>, scalar_prefetch = 0 : i64, scratch_operands = 0 : i64, tpu.core_type = #tpu.core_type<tc>, window_params = [{transform_indices = @transform_0, window_bounds = array<i64: 8, 128>}, {transform_indices = @transform_1, window_bounds = array<i64: 1, 128>}, {transform_indices = @transform_2, window_bounds = array<i64: 1, 128>}, {transform_indices = @transform_3, window_bounds = array<i64: 1, 8, 128>}]} {
    %c0 = arith.constant 0 : index
    %c0_0 = arith.constant 0 : index
    %0 = vector.load %arg1[%c0, %c0_0] : memref<8x128xf32, #tpu.memory_space<vmem>>, vector<8x128xf32>
    %c0_1 = arith.constant 0 : index
    %c0_2 = arith.constant 0 : index
    %1 = vector.load %arg2[%c0_1, %c0_2] : memref<1x128xi32, #tpu.memory_space<vmem>>, vector<1x128xi32>
    %c0_3 = arith.constant 0 : index
    %c0_4 = arith.constant 0 : index
    %2 = vector.load %arg3[%c0_3, %c0_4] : memref<1x128xf32, #tpu.memory_space<vmem>>, vector<1x128xf32>
    %3 = tpu.iota {dimensions = array<i32: 0>} : vector<8x128xi32>
    %4 = vector.broadcast %1 : vector<1x128xi32> to vector<8x128xi32>
    %5 = arith.cmpi eq, %3, %4 : vector<8x128xi32>
    %cst = arith.constant 0.000000e+00 : f32
    %6 = vector.broadcast %cst : f32 to vector<8x128xf32>
    %7 = arith.select %5, %0, %6 : vector<8x128xi1>, vector<8x128xf32>
    %cst_5 = arith.constant dense<0.000000e+00> : vector<128xf32>
    %8 = vector.multi_reduction <add>, %7, %cst_5 [0] : vector<8x128xf32> to vector<128xf32>
    %9 = vector.shape_cast %8 : vector<128xf32> to vector<1x128xf32>
    %cst_6 = arith.constant dense<0xFF800000> : vector<128xf32>
    %10 = vector.multi_reduction <maximumf>, %0, %cst_6 [0] : vector<8x128xf32> to vector<128xf32>
    %11 = vector.shape_cast %10 : vector<128xf32> to vector<1x128xf32>
    %12 = vector.broadcast %11 : vector<1x128xf32> to vector<8x128xf32>
    %13 = arith.subf %0, %12 : vector<8x128xf32>
    %14 = math.exp %13 : vector<8x128xf32>
    %cst_7 = arith.constant dense<0.000000e+00> : vector<128xf32>
    %15 = vector.multi_reduction <add>, %14, %cst_7 [0] : vector<8x128xf32> to vector<128xf32>
    %16 = vector.shape_cast %15 : vector<128xf32> to vector<1x128xf32>
    %17 = math.log %16 : vector<1x128xf32>
    %18 = arith.addf %11, %17 : vector<1x128xf32>
    %19 = arith.subf %18, %9 : vector<1x128xf32>
    %20 = arith.mulf %2, %19 : vector<1x128xf32>
    %21 = vector.shape_cast %20 : vector<1x128xf32> to vector<1x1x128xf32>
    %cst_8 = arith.constant dense<0.000000e+00> : vector<1xf32>
    %22 = vector.multi_reduction <add>, %21, %cst_8 [1, 2] : vector<1x1x128xf32> to vector<1xf32>
    %23 = vector.shape_cast %22 : vector<1xf32> to vector<1x1x1xf32>
    %24 = vector.extract %23[0, 0, 0] : f32 from vector<1x1x1xf32>
    %25 = vector.broadcast %24 : f32 to vector<1x8x128xf32>
    %c0_9 = arith.constant 0 : index
    %c0_10 = arith.constant 0 : index
    %c0_11 = arith.constant 0 : index
    %26 = vector.load %arg4[%c0_9, %c0_10, %c0_11] : memref<1x8x128xf32, #tpu.memory_space<vmem>>, vector<1x8x128xf32>
    tpu.vector_store %arg4[%c0_9, %c0_10, %c0_11], %25 {strides = array<i32>} : memref<1x8x128xf32, #tpu.memory_space<vmem>>, vector<1x8x128xf32>,
    return
  }
  func.func @transform_0(%arg0: i32) -> (i32, i32) {
    %c0_i32 = arith.constant 0 : i32
    %c0_i32_0 = arith.constant 0 : i32
    return %c0_i32, %arg0 : i32, i32
  }
  func.func @transform_1(%arg0: i32) -> (i32, i32) {
    %c0_i32 = arith.constant 0 : i32
    %c0_i32_0 = arith.constant 0 : i32
    return %c0_i32, %arg0 : i32, i32
  }
  func.func @transform_2(%arg0: i32) -> (i32, i32) {
    %c0_i32 = arith.constant 0 : i32
    %c0_i32_0 = arith.constant 0 : i32
    return %c0_i32, %arg0 : i32, i32
  }
  func.func @transform_3(%arg0: i32) -> (i32, i32, i32) {
    %c0_i32 = arith.constant 0 : i32
    %c0_i32_0 = arith.constant 0 : i32
    %c0_i32_1 = arith.constant 0 : i32
    return %arg0, %c0_i32, %c0_i32_0 : i32, i32, i32
  }
}

</mosaic_0001>

<bundles_post_ra>
// kernel: tpu_custom_call.1
= control target key start
LH: loop header
LB: loop body
LE: loop exit
PB: predicated region body
PF: predicated region fallthrough
CT: control target
= control target key end

     0   :  { %8 = vsyncpa [#allocation3], 0  ;;  %s231_s0 = inlined_call_operand.hbm [shape: f32[8,128], index: 0, kind: input, shape index: {}]   ;;  %s232_s1 = inlined_call_operand.hbm [shape: s32[1,128], index: 1, kind: input, shape index: {}]   ;;  %s233_s2 = inlined_call_operand.vmem [shape: f32[1,128], index: 2, kind: input, shape index: {}]   ;;  %s234_s3 = inlined_call_operand.hbm [shape: f32[1,8,128], index: 3, kind: output, shape index: {}]  }
   0x1   :  { %9 = vsyncpa [#allocation6], 0 }
   0x2   :  { %10 = vsyncpa [#allocation4], 0  ;;  %s16_s14 = sshll.u32 %s231_s0, 4  ;;  %s196_s15 = smov [#allocation2]   ;;  %s17_s14 = int_to_ptr.hbm [resolvable:$true] %s16_s14 }
   0x3   :  { %s18_s16 = sshll.u32 %s196_s15, 4  ;;  %s27_s19 = sshll.u32 %s232_s1, 4  ;;  %s19_s16 = int_to_ptr.vmem [resolvable:$true] %s18_s16  ;;  %s28_s19 = int_to_ptr.hbm [resolvable:$true] %s27_s19 }
   0x4   :  { %21 = dma.hbm_to_vmem [thread:$0]  %s17_s14, 128, %s19_s16, [#allocation3]  }
   0x5   :  { %s197_s20 = smov [#allocation5]  }
   0x6   :  { %s29_s21 = sshll.u32 %s197_s20, 4  ;;  %s30_s21 = int_to_ptr.vmem [resolvable:$true] %s29_s21 }
   0x7   :  { %32 = dma.hbm_to_vmem [thread:$0]  %s28_s19, 16, %s30_s21, [#allocation6]  }
   0x8   :  { %190 = dma.done.wait [#allocation3], 128  }
   0x9   :  { %191 = vsyncadd [#allocation3], 4294967168 }
   0xa   :  { %192 = dma.done.wait [#allocation6], 16  }
   0xb   :  { %193 = vsyncadd [#allocation6], 4294967280  ;;  %v43_v0 = vld [vmem:[#allocation2] sm:$0xff]  ;;  %v46_v5 = vlaneseq  ;;  %v113_v9 = vld [vmem:[#allocation5] ss:$0 sm:$0xff]  ;;  %vm77_vm1 = vcmask 1040384  }
   0xc   :  { %v57_v1 = vrot.slane %v43_v0, 4  ;;  %v45_v29 = vld [vmem:[%s233_s2] sm:$0x1]  ;;  %s198_s22 = smov [#allocation7]   ;;  %s97_s26 = sshll.u32 %s234_s3, 4  ;;  %s98_s26 = int_to_ptr.hbm [resolvable:$true] %s97_s26 }
   0xd   :  { %v47_v8 = vshrl.u32 %v46_v5, 7  ;;  %s95_s23 = sshll.u32 %s198_s22, 4  ;;  %s96_s23 = int_to_ptr.vmem [resolvable:$true] %s95_s23 }
   0xe   :  { %v58_v2 = vmax.f32 %v43_v0, %v57_v1 }
   0xf   :  { %vm49_vm0 = vcmp.eq.s32.totalorder %v47_v8, %v113_v9 }
  0x10   :  { %v59_v3 = vrot.slane %v58_v2, 2  ;;  %v50_v12 = vsel %vm49_vm0, %v43_v0, 0.0 }
  0x11   :  { %v51_v14 = vrot.slane %v50_v12, 4 }
  0x12   :  { %v60_v4 = vmax.f32 %v58_v2, %v59_v3 }
  0x13   :  { %v52_v17 = vadd.f32 %v51_v14, %v50_v12 }
  0x14   :  { %v61_v6 = vrot.slane %v60_v4, 1 }
  0x15   :  { %v53_v20 = vrot.slane %v52_v17, 2 }
  0x16   :  { %v62_v7 = vmax.f32 %v60_v4, %v61_v6 }
  0x17   :  { %v54_v23 = vadd.f32 %v53_v20, %v52_v17 }
  0x18   :  { %v63_v10 = vsub.f32 %v43_v0, %v62_v7 }
  0x19   :  { %v55_v24 = vrot.slane %v54_v23, 1 }
  0x1a   :  { %v64_v11 = vmul.f32 1.442695, %v63_v10 }
  0x1b   :  { %v56_v26 = vadd.f32 %v55_v24, %v54_v23 }
  0x1c   :  { %114 = vpow2.f32 %v64_v11 }
  0x22   :  { %v115_v13 = vpop.eup %114 }
  0x23   :  { %v66_v15 = vrot.slane %v115_v13, 4 }
  0x25   :  { %v67_v16 = vadd.f32 %v115_v13, %v66_v15 }
  0x27   :  { %v68_v18 = vrot.slane %v67_v16, 2 }
  0x29   :  { %v69_v19 = vadd.f32 %v68_v18, %v67_v16 }
  0x2b   :  { %v70_v21 = vrot.slane %v69_v19, 1 }
  0x2d   :  { %v71_v22 = vadd.f32 %v70_v21, %v69_v19 }
  0x2f   :  { %116 = vlog2.f32 %v71_v22 }
  0x35   :  { %v117_v25 = vpop.eup %116 }
  0x36   :  { %v73_v27 = vmul.f32 0.6931472, %v117_v25 }
  0x38   :  { %v74_v28 = vadd.f32 %v73_v27, %v62_v7 }
  0x3a   :  { %v75_v30 = vsub.f32 %v74_v28, %v56_v26 }
  0x3c   :  { %v76_v31 = vmul.f32 %v75_v30, %v45_v29 }
  0x3e   :  { %v78_v32 = vsel %vm77_vm1, %v76_v31, 0.0 }
  0x3f   :  { %79 = vadd.xlane.f32.xlu0 %v78_v32 }
  0xb2   :  { %v80_v33 = vpop.xlane.xlu0 %79 }
  0xb3   :  { %v81_v34 = vrot.slane %v80_v33, 4 }
  0xb5   :  { %v82_v35 = vadd.f32 %v81_v34, %v80_v33 }
  0xb7   :  { %v83_v36 = vrot.slane %v82_v35, 2 }
  0xb9   :  { %v84_v37 = vadd.f32 %v83_v36, %v82_v35 }
  0xbb   :  { %v85_v38 = vrot.slane %v84_v37, 1 }
  0xbd   :  { %v86_v39 = vadd.f32 %v85_v38, %v84_v37 }
  0xbf   :  { %108 = vpush %v86_v39 }
  0xf0   :  { %s109_s2 = spop %108 }
  0xf1   :  { %v88_v40 = vstv %s109_s2 }
  0xf2   :  { %89 = vst [vmem:[#allocation7] sm:$0xff] %v88_v40 }
  0xf3   :  { %100 = dma.vmem_to_hbm [thread:$0]  %s96_s23, 128, %s98_s26, [#allocation4]  }
  0xf4   :  { %194 = dma.done.wait [#allocation4], 128  }
  0xf5   :  { %195 = vsyncadd [#allocation4], 4294967168 }
  0xf6   :  { %105 = vsyncpa [#allocation3], 1 }
  0xf7   :  { %106 = vsyncpa [#allocation6], 1 }
  0xf8   :  { %107 = vsyncpa [#allocation4], 1 }

</bundles_post_ra>
